<compile_context>
chip_gen: v7x
topology: tpu7x:2x2x1
jax: 0.10.0
libtpu: 0.0.40
codegen_flags: <defaults>
</compile_context>

<pallas_src>
import functools
import math

import jax
import jax.numpy as jnp
from jax.experimental import pallas as pl
from jax.experimental.pallas import tpu as pltpu

K_IN = 28 * 28   # 784 — streamed unpadded; compiler lane-pads to 896 inside VMEM
K_VMEM = 896     # lane-padded size, used only for the VMEM budget estimate
HID = 128
N_OUT = 10
N_PAD = 128      # lane-dense output width


def perceptron_kernel(x_ref, w1_ref, b1_ref, w2_ref, b2_ref, o_ref):
    # fc1: cast the f32 tile to bf16 in VMEM (no extra HBM pass), f32 MXU accumulation.
    x = x_ref[...].astype(jnp.bfloat16)
    h = jnp.dot(x, w1_ref[...], preferred_element_type=jnp.float32) + b1_ref[...]
    # ReLU
    h = jnp.maximum(h, 0.0)
    # Dropout(p=0.5): eval-mode semantics (identity).
    # TODO(synk): training-mode stochastic dropout (Bernoulli mask + 1/(1-p) scaling) not
    # reproduced; would need pltpu.prng_seed / prng_random_bits and a seed input.
    # fc2 in bf16 (f32 accumulation); padded columns have weight 0 and bias -1e30.
    logits = jnp.dot(h.astype(jnp.bfloat16), w2_ref[...],
                     preferred_element_type=jnp.float32) + b2_ref[...]
    # log_softmax over 128 padded columns == over the 10 real ones
    # (exp(pad - m) underflows to exactly 0 in f32).
    m = jnp.max(logits, axis=-1, keepdims=True)
    lse = jnp.log(jnp.sum(jnp.exp(logits - m), axis=-1, keepdims=True)) + m
    o_ref[...] = (logits - lse).astype(o_ref.dtype)


def _round_up(v, m):
    return ((v + m - 1) // m) * m


@functools.partial(jax.jit, static_argnames=("tb",))
def perceptron_forward(x_nchw, w1, b1, w2, b2, *, tb=2048):
    """x_nchw: (B, 1, 28, 28) float32. Returns (B, 10) log-probabilities (f32)."""
    B = x_nchw.shape[0]
    x_flat = x_nchw.reshape(B, -1)               # torch.flatten(x, 1); metadata-only
    assert x_flat.shape[1] == K_IN

    # Weights prepared once (tiny arrays): bf16 matmul operands, f32 biases.
    w1b = w1.astype(jnp.bfloat16)                                     # (784, 128)
    b1p = b1.astype(jnp.float32)                                      # (1, 128)
    w2p = jnp.pad(w2.astype(jnp.bfloat16), ((0, 0), (0, N_PAD - N_OUT)))
    b2p = jnp.pad(b2.astype(jnp.float32), ((0, 0), (0, N_PAD - N_OUT)),
                  constant_values=-1e30)

    # Batch tile: multiple of 8 (f32 sublane), capped at `tb`.  No batch padding of x in
    # HBM — the ragged last tile is handled by masked edge reads/writes.
    tb_eff = min(tb, _round_up(B, 8))
    n_tiles = pl.cdiv(B, tb_eff)
    # v7x megacore: with >1 tile, prefer an even tile count so both TensorCores stay busy.
    if n_tiles > 1 and n_tiles % 2 == 1:
        tb_eff = max(8, _round_up(pl.cdiv(B, n_tiles + 1), 8))
        n_tiles = pl.cdiv(B, tb_eff)
    grid = (n_tiles,)

    # VMEM budget (double-buffered streamed tiles + resident weights + activations).
    vmem_bytes = (2 * tb_eff * K_VMEM * 4        # x tiles (f32, double-buffered)
                  + tb_eff * K_VMEM * 2          # in-kernel bf16 copy of x
                  + 2 * tb_eff * N_PAD * 4       # out tiles (f32, double-buffered)
                  + tb_eff * HID * (4 + 2)       # h (f32) + bf16 copy
                  + 2 * K_VMEM * HID * 2         # w1 (bf16)
                  + 2 * HID * N_PAD * 2          # w2 (bf16)
                  + 4 * 8 * N_PAD * 4)           # biases (sublane-padded)
    try:
        vmem_cap = pltpu.get_tpu_info().vmem_capacity_bytes   # 64 MiB on v7x, 128 elsewhere
    except Exception:
        vmem_cap = 64 << 20
    vmem_limit = min(max(int(vmem_bytes) + (4 << 20), 16 << 20), (int(vmem_cap) * 4) // 5)

    cost = pl.CostEstimate(
        flops=2 * B * (K_IN * HID + HID * N_PAD),
        transcendentals=B * N_PAD,
        bytes_accessed=B * K_IN * 4 + K_IN * HID * 2 + HID * N_PAD * 2 + B * N_PAD * 4,
    )

    out_padded = pl.pallas_call(
        perceptron_kernel,
        out_shape=jax.ShapeDtypeStruct((B, N_PAD), jnp.float32),
        grid=grid,
        in_specs=[
            pl.BlockSpec((tb_eff, K_IN), lambda i: (i, 0)),   # x tile (f32, streamed)
            pl.BlockSpec((K_IN, HID),    lambda i: (0, 0)),   # w1 (VMEM-resident, bf16)
            pl.BlockSpec((1, HID),       lambda i: (0, 0)),   # b1
            pl.BlockSpec((HID, N_PAD),   lambda i: (0, 0)),   # w2 (bf16, col-padded)
            pl.BlockSpec((1, N_PAD),     lambda i: (0, 0)),   # b2 (padded with -1e30)
        ],
        out_specs=pl.BlockSpec((tb_eff, N_PAD), lambda i: (i, 0)),
        compiler_params=pltpu.CompilerParams(
            dimension_semantics=("parallel",),
            vmem_limit_bytes=int(vmem_limit),
        ),
        cost_estimate=cost,
    )(x_flat, w1b, b1p, w2p, b2p)

    # Column slice back to the 10 real classes.  (Consumers that can accept the
    # lane-padded (B, 128) slab can skip this to save one small HBM pass.)
    return out_padded[:, :N_OUT]


def init_params(key):
    """Deterministic init mirroring nn.Linear default (U[-1/sqrt(fan_in), 1/sqrt(fan_in)])."""
    k1, k2, k3, k4 = jax.random.split(key, 4)
    bound1 = 1.0 / math.sqrt(K_IN)
    w1 = jax.random.uniform(k1, (K_IN, HID), jnp.float32, -bound1, bound1)   # stored (in, out)
    b1 = jax.random.uniform(k2, (1, HID), jnp.float32, -bound1, bound1)
    bound2 = 1.0 / math.sqrt(HID)
    w2 = jax.random.uniform(k3, (HID, N_OUT), jnp.float32, -bound2, bound2)
    b2 = jax.random.uniform(k4, (1, N_OUT), jnp.float32, -bound2, bound2)
    return w1, b1, w2, b2


if __name__ == "__main__":
    key = jax.random.PRNGKey(0)
    kx, kp = jax.random.split(key)
    w1, b1, w2, b2 = init_params(kp)

    def ref_bf16(x):
        # Same bf16-operand / f32-accumulation math as the kernel (tight tolerance).
        xf = x.reshape(x.shape[0], -1)
        h = jnp.dot(xf.astype(jnp.bfloat16), w1.astype(jnp.bfloat16),
                    preferred_element_type=jnp.float32) + b1
        h = jnp.maximum(h, 0.0)
        logits = jnp.dot(h.astype(jnp.bfloat16), w2.astype(jnp.bfloat16),
                         preferred_element_type=jnp.float32) + b2
        return jax.nn.log_softmax(logits, axis=1)

    def ref_f32(x):
        # Full-f32 math matching the original PyTorch module (loose tolerance).
        xf = x.reshape(x.shape[0], -1)
        h = jnp.maximum(xf @ w1 + b1, 0.0)
        return jax.nn.log_softmax(h @ w2 + b2, axis=1)

    for B in (8, 10):   # B=10 exercises the ragged (masked) last batch tile
        x = jax.random.normal(jax.random.fold_in(kx, B), (B, 1, 28, 28), jnp.float32)
        out = jax.block_until_ready(perceptron_forward(x, w1, b1, w2, b2))
        assert out.shape == (B, N_OUT)
        assert bool(jnp.all(jnp.isfinite(out)))
        assert jnp.allclose(out, ref_bf16(x), atol=5e-3, rtol=5e-3)
        assert jnp.allclose(out, ref_f32(x), atol=5e-2, rtol=5e-2)

    print("KERNEL_OK")
</pallas_src>

<mosaic_0001>
module attributes {stable_mosaic.version = 11 : i64} {
  func.func @perceptron_kernel(%arg0: i32, %arg1: memref<8x784xf32, #tpu.memory_space<vmem>>, %arg2: memref<784x128xbf16, #tpu.memory_space<vmem>>, %arg3: memref<1x128xf32, #tpu.memory_space<vmem>>, %arg4: memref<128x128xbf16, #tpu.memory_space<vmem>>, %arg5: memref<1x128xf32, #tpu.memory_space<vmem>>, %arg6: memref<8x128xf32, #tpu.memory_space<vmem>>) attributes {dimension_semantics = [#tpu.dimension_semantics<parallel>], iteration_bounds = array<i64: 1>, scalar_prefetch = 0 : i64, scratch_operands = 0 : i64, tpu.core_type = #tpu.core_type<tc>, window_params = [{transform_indices = @transform_0, window_bounds = array<i64: 8, 784>}, {pipeline_mode = #tpu.pipeline_mode<synchronous>, transform_indices = @transform_1, window_bounds = array<i64: 784, 128>}, {pipeline_mode = #tpu.pipeline_mode<synchronous>, transform_indices = @transform_2, window_bounds = array<i64: 1, 128>}, {pipeline_mode = #tpu.pipeline_mode<synchronous>, transform_indices = @transform_3, window_bounds = array<i64: 128, 128>}, {pipeline_mode = #tpu.pipeline_mode<synchronous>, transform_indices = @transform_4, window_bounds = array<i64: 1, 128>}, {transform_indices = @transform_5, window_bounds = array<i64: 8, 128>}]} {
    %c0 = arith.constant 0 : index
    %c0_0 = arith.constant 0 : index
    %0 = vector.load %arg1[%c0, %c0_0] : memref<8x784xf32, #tpu.memory_space<vmem>>, vector<8x784xf32>
    %1 = arith.truncf %0 : vector<8x784xf32> to vector<8x784xbf16>
    %c0_1 = arith.constant 0 : index
    %c0_2 = arith.constant 0 : index
    %2 = vector.load %arg2[%c0_1, %c0_2] : memref<784x128xbf16, #tpu.memory_space<vmem>>, vector<784x128xbf16>
    %cst = arith.constant dense<0.000000e+00> : vector<8x128xf32>
    %3 = tpu.matmul %1, %2, %cst {dimension_numbers = #tpu.dot_dimension_numbers<[1], [0], [0], [1], [0, 0, 1, 1], [], []>} : vector<8x784xbf16>, vector<784x128xbf16>, vector<8x128xf32> -> vector<8x128xf32>
    %c0_3 = arith.constant 0 : index
    %c0_4 = arith.constant 0 : index
    %4 = vector.load %arg3[%c0_3, %c0_4] : memref<1x128xf32, #tpu.memory_space<vmem>>, vector<1x128xf32>
    %5 = vector.broadcast %4 : vector<1x128xf32> to vector<8x128xf32>
    %6 = arith.addf %3, %5 : vector<8x128xf32>
    %cst_5 = arith.constant 0.000000e+00 : f32
    %7 = vector.broadcast %cst_5 : f32 to vector<8x128xf32>
    %8 = arith.maximumf %6, %7 : vector<8x128xf32>
    %9 = arith.truncf %8 : vector<8x128xf32> to vector<8x128xbf16>
    %c0_6 = arith.constant 0 : index
    %c0_7 = arith.constant 0 : index
    %10 = vector.load %arg4[%c0_6, %c0_7] : memref<128x128xbf16, #tpu.memory_space<vmem>>, vector<128x128xbf16>
    %cst_8 = arith.constant dense<0.000000e+00> : vector<8x128xf32>
    %11 = tpu.matmul %9, %10, %cst_8 {dimension_numbers = #tpu.dot_dimension_numbers<[1], [0], [0], [1], [0, 0, 1, 1], [], []>} : vector<8x128xbf16>, vector<128x128xbf16>, vector<8x128xf32> -> vector<8x128xf32>
    %c0_9 = arith.constant 0 : index
    %c0_10 = arith.constant 0 : index
    %12 = vector.load %arg5[%c0_9, %c0_10] : memref<1x128xf32, #tpu.memory_space<vmem>>, vector<1x128xf32>
    %13 = vector.broadcast %12 : vector<1x128xf32> to vector<8x128xf32>
    %14 = arith.addf %11, %13 : vector<8x128xf32>
    %cst_11 = arith.constant dense<0xFF800000> : vector<8xf32>
    %15 = vector.multi_reduction <maximumf>, %14, %cst_11 [1] : vector<8x128xf32> to vector<8xf32>
    %16 = vector.shape_cast %15 : vector<8xf32> to vector<8x1xf32>
    %17 = vector.broadcast %16 : vector<8x1xf32> to vector<8x128xf32>
    %18 = arith.subf %14, %17 : vector<8x128xf32>
    %19 = math.exp %18 : vector<8x128xf32>
    %cst_12 = arith.constant dense<0.000000e+00> : vector<8xf32>
    %20 = vector.multi_reduction <add>, %19, %cst_12 [1] : vector<8x128xf32> to vector<8xf32>
    %21 = vector.shape_cast %20 : vector<8xf32> to vector<8x1xf32>
    %22 = math.log %21 : vector<8x1xf32>
    %23 = arith.addf %22, %16 : vector<8x1xf32>
    %24 = vector.broadcast %23 : vector<8x1xf32> to vector<8x128xf32>
    %25 = arith.subf %14, %24 : vector<8x128xf32>
    %c0_13 = arith.constant 0 : index
    %c0_14 = arith.constant 0 : index
    %26 = vector.load %arg6[%c0_13, %c0_14] : memref<8x128xf32, #tpu.memory_space<vmem>>, vector<8x128xf32>
    tpu.vector_store %arg6[%c0_13, %c0_14], %25 {strides = array<i32>} : memref<8x128xf32, #tpu.memory_space<vmem>>, vector<8x128xf32>,
    return
  }
  func.func @transform_0(%arg0: i32) -> (i32, i32) {
    %c0_i32 = arith.constant 0 : i32
    %c0_i32_0 = arith.constant 0 : i32
    return %arg0, %c0_i32 : i32, i32
  }
  func.func @transform_1(%arg0: i32) -> (i32, i32) {
    %c0_i32 = arith.constant 0 : i32
    %c0_i32_0 = arith.constant 0 : i32
    %c0_i32_1 = arith.constant 0 : i32
    return %c0_i32, %c0_i32_0 : i32, i32
  }
  func.func @transform_2(%arg0: i32) -> (i32, i32) {
    %c0_i32 = arith.constant 0 : i32
    %c0_i32_0 = arith.constant 0 : i32
    %c0_i32_1 = arith.constant 0 : i32
    return %c0_i32, %c0_i32_0 : i32, i32
  }
  func.func @transform_3(%arg0: i32) -> (i32, i32) {
    %c0_i32 = arith.constant 0 : i32
    %c0_i32_0 = arith.constant 0 : i32
    %c0_i32_1 = arith.constant 0 : i32
    return %c0_i32, %c0_i32_0 : i32, i32
  }
  func.func @transform_4(%arg0: i32) -> (i32, i32) {
    %c0_i32 = arith.constant 0 : i32
    %c0_i32_0 = arith.constant 0 : i32
    %c0_i32_1 = arith.constant 0 : i32
    return %c0_i32, %c0_i32_0 : i32, i32
  }
  func.func @transform_5(%arg0: i32) -> (i32, i32) {
    %c0_i32 = arith.constant 0 : i32
    %c0_i32_0 = arith.constant 0 : i32
    return %arg0, %c0_i32 : i32, i32
  }
}

</mosaic_0001>

<bundles_post_ra>
// kernel: perceptron_forward.1
= control target key start
LH: loop header
LB: loop body
LE: loop exit
PB: predicated region body
PF: predicated region fallthrough
CT: control target
= control target key end

     0   :  { %v989_v44 = vmov 0.0   ;;  %vm990_vm0 = vmmov 0   ;;  %vm435_vm1 = vcmask 130048   ;;  %s1245_s0 = inlined_call_operand.vmem [shape: f32[8,784], index: 0, kind: input, shape index: {}]   ;;  %s1246_s1 = inlined_call_operand.vmem [shape: bf16[784,128], index: 1, kind: input, shape index: {}]   ;;  %s1247_s2 = inlined_call_operand.vmem [shape: f32[1,128], index: 2, kind: input, shape index: {}]   ;;  %s1248_s3 = inlined_call_operand.vmem [shape: bf16[128,128], index: 3, kind: input, shape index: {}]   ;;  %s1249_s4 = inlined_call_operand.vmem [shape: f32[1,128], index: 4, kind: input, shape index: {}]   ;;  %s1250_s5 = inlined_call_operand.hbm [shape: f32[8,128], index: 5, kind: output, shape index: {}]  }
   0x1   :  { %v904_v0 = vld [vmem:[%s1246_s1 + $0x40] sm:$0xff]   ;;  %v908_v4 = vld [vmem:[%s1246_s1 + $0x48] sm:$0xff]   ;;  %v912_v8 = vld [vmem:[%s1246_s1 + $0x50] sm:$0xff]  }
   0x2   :  { %v905_v1 = vld [vmem:[%s1246_s1] sm:$0xff]   ;;  %798 = vmatprep.subr.bf16.mxu0 %v904_v0  ;;  %v909_v5 = vld [vmem:[%s1246_s1 + $0x8] sm:$0xff]   ;;  %v913_v9 = vld [vmem:[%s1246_s1 + $0x10] sm:$0xff]  }
   0x3   :  { %v906_v2 = vld [vmem:[%s1246_s1 + $0xc0] sm:$0xff]   ;;  %799 = vmatpush3.bf16.msra.mxu0 %v905_v1  ;;  %v910_v6 = vld [vmem:[%s1246_s1 + $0xc8] sm:$0xff]   ;;  %v914_v10 = vld [vmem:[%s1246_s1 + $0xd0] sm:$0xff]  }
   0x4   :  { %v907_v3 = vld [vmem:[%s1246_s1 + $0x80] sm:$0xff]   ;;  %820 = vmatprep.subr.bf16.mxu1 %v906_v2  ;;  %800 = vmatprep.subr.bf16.mxu0 %v908_v4  ;;  %v911_v7 = vld [vmem:[%s1246_s1 + $0x88] sm:$0xff]   ;;  %v915_v11 = vld [vmem:[%s1246_s1 + $0x90] sm:$0xff]  }
   0x5   :  { %821 = vmatpush3.bf16.msra.mxu1 %v907_v3  ;;  %v916_v12 = vld [vmem:[%s1246_s1 + $0x58] sm:$0xff]   ;;  %v920_v16 = vld [vmem:[%s1246_s1 + $0x60] sm:$0xff]   ;;  %v924_v20 = vld [vmem:[%s1246_s1 + $0x68] sm:$0xff]  }
   0x6   :  { %822 = vmatprep.subr.bf16.mxu1 %v910_v6  ;;  %v917_v13 = vld [vmem:[%s1246_s1 + $0x18] sm:$0xff]   ;;  %v921_v17 = vld [vmem:[%s1246_s1 + $0x20] sm:$0xff]   ;;  %v925_v21 = vld [vmem:[%s1246_s1 + $0x28] sm:$0xff]  }
   0x7   :  { %801 = vmatpush3.bf16.msra.mxu0 %v909_v5  ;;  %v918_v14 = vld [vmem:[%s1246_s1 + $0xd8] sm:$0xff]   ;;  %v922_v18 = vld [vmem:[%s1246_s1 + $0xe0] sm:$0xff]   ;;  %v926_v22 = vld [vmem:[%s1246_s1 + $0xe8] sm:$0xff]  }
   0x8   :  { %802 = vmatprep.subr.bf16.mxu0 %v912_v8  ;;  %v919_v15 = vld [vmem:[%s1246_s1 + $0x98] sm:$0xff]   ;;  %v923_v19 = vld [vmem:[%s1246_s1 + $0xa0] sm:$0xff]   ;;  %v927_v23 = vld [vmem:[%s1246_s1 + $0xa8] sm:$0xff]  }
   0x9   :  { %823 = vmatpush3.bf16.msra.mxu1 %v911_v7  ;;  %v928_v24 = vld [vmem:[%s1246_s1 + $0x70] sm:$0xff]   ;;  %v932_v28 = vld [vmem:[%s1246_s1 + $0x78] sm:$0xff]   ;;  %v23_v31 = vld [vmem:[%s1245_s0 + $0x8] sm:$0xff] }
   0xa   :  { %824 = vmatprep.subr.bf16.mxu1 %v914_v10  ;;  %v929_v25 = vld [vmem:[%s1246_s1 + $0x30] sm:$0xff]   ;;  %v933_v29 = vld [vmem:[%s1246_s1 + $0x38] sm:$0xff]   ;;  %v30_v32 = vpack.c.bf16 %v23_v31, %v23_v31  ;;  %v22_v34 = vld [vmem:[%s1245_s0] sm:$0xff] }
   0xb   :  { %803 = vmatpush3.bf16.msra.mxu0 %v913_v9  ;;  %v930_v26 = vld [vmem:[%s1246_s1 + $0xf0] sm:$0xff]   ;;  %v934_v30 = vld [vmem:[%s1246_s1 + $0xf8] sm:$0xff]   ;;  %v29_v35 = vpack.c.bf16 %v22_v34, %v22_v34  ;;  %v936_v36 = vld [vmem:[%s1246_s1 + $0x140] sm:$0xff]  }
   0xc   :  { %804 = vmatprep.subr.bf16.mxu0 %v916_v12  ;;  %v931_v27 = vld [vmem:[%s1246_s1 + $0xb0] sm:$0xff]   ;;  %v935_v33 = vld [vmem:[%s1246_s1 + $0xb8] sm:$0xff]   ;;  %471 = vmatprep.mubr.bf16.mxu0 %v30_v32  ;;  %v937_v39 = vld [vmem:[%s1246_s1 + $0x100] sm:$0xff]  }
   0xd   :  { %825 = vmatpush3.bf16.msra.mxu1 %v915_v11  ;;  %v25_v37 = vld [vmem:[%s1245_s0 + $0x18] sm:$0xff]  ;;  %v24_v40 = vld [vmem:[%s1245_s0 + $0x10] sm:$0xff]  ;;  %v938_v42 = vld [vmem:[%s1246_s1 + $0x148] sm:$0xff]  }
   0xe   :  { %826 = vmatprep.subr.bf16.mxu1 %v918_v14  ;;  %v32_v38 = vpack.c.bf16 %v25_v37, %v25_v37  ;;  %v31_v41 = vpack.c.bf16 %v24_v40, %v24_v40  ;;  %v939_v43 = vld [vmem:[%s1246_s1 + $0x108] sm:$0xff]   ;;  %v940_v45 = vld [vmem:[%s1246_s1 + $0x150] sm:$0xff]   ;;  %v942_v47 = vld [vmem:[%s1246_s1 + $0x158] sm:$0xff]  }
   0xf   :  { %805 = vmatpush3.bf16.msra.mxu0 %v917_v13  ;;  %v941_v46 = vld [vmem:[%s1246_s1 + $0x110] sm:$0xff]   ;;  %v943_v48 = vld [vmem:[%s1246_s1 + $0x118] sm:$0xff]   ;;  %v944_v49 = vld [vmem:[%s1246_s1 + $0x160] sm:$0xff]  }
  0x10   :  { %806 = vmatprep.subr.bf16.mxu0 %v920_v16  ;;  %511 = vmatprep.mubr.bf16.mxu1 %v32_v38  ;;  %v945_v50 = vld [vmem:[%s1246_s1 + $0x120] sm:$0xff]   ;;  %v946_v51 = vld [vmem:[%s1246_s1 + $0x168] sm:$0xff]   ;;  %v948_v55 = vld [vmem:[%s1246_s1 + $0x170] sm:$0xff]  }
  0x11   :  { %827 = vmatpush3.bf16.msra.mxu1 %v919_v15  ;;  %v947_v52 = vld [vmem:[%s1246_s1 + $0x128] sm:$0xff]   ;;  %v952_v53 = vld [vmem:[%s1246_s1 + $0x180] sm:$0xff]   ;;  %v28_v57 = vld [vmem:[%s1245_s0 + $0x30] sm:$0xff] }
  0x12   :  { %828 = vmatprep.subr.bf16.mxu1 %v922_v18  ;;  %v27_v54 = vld [vmem:[%s1245_s0 + $0x28] sm:$0xff]  ;;  %v35_v58 = vpack.c.bf16 %v28_v57, %v28_v57  ;;  %v949_v59 = vld [vmem:[%s1246_s1 + $0x130] sm:$0xff]  }
  0x13   :  { %807 = vmatpush3.bf16.msra.mxu0 %v921_v17  ;;  %v34_v56 = vpack.c.bf16 %v27_v54, %v27_v54 }
  0x14   :  { %808 = vmatprep.subr.bf16.mxu0 %v924_v20 }
  0x15   :  { %829 = vmatpush3.bf16.msra.mxu1 %v923_v19 }
  0x16   :  { %830 = vmatprep.subr.bf16.mxu1 %v926_v22 }
  0x17   :  { %809 = vmatpush3.bf16.msra.mxu0 %v925_v21 }
  0x18   :  { %810 = vmatprep.subr.bf16.mxu0 %v928_v24 }
  0x19   :  { %831 = vmatpush3.bf16.msra.mxu1 %v927_v23 }
  0x1a   :  { %832 = vmatprep.subr.bf16.mxu1 %v930_v26 }
  0x1b   :  { %811 = vmatpush3.bf16.msra.mxu0 %v929_v25 }
  0x1c   :  { %812 = vmatprep.subr.bf16.mxu0 %v932_v28 }
  0x1d   :  { %833 = vmatpush3.bf16.msra.mxu1 %v931_v27 }
  0x1e   :  { %834 = vmatprep.subr.bf16.mxu1 %v934_v30 }
  0x1f   :  { %813 = vmatpush3.bf16.msra.mxu0 %v933_v29 }
  0x20   :  { %842 = vmatprep.subr.bf16.mxu0 %v936_v36 }
  0x21   :  { %835 = vmatpush3.bf16.msra.mxu1 %v935_v33 }
  0x22   :  { %472 = vmatmul.mubr.bf16.vlgmr.msra.gmra.mrb[0].mxu0 %v29_v35  ;;  %875 = vmatprep.subr.bf16.mxu1 %v989_v44 }
  0x23   :  { %843 = vmatpush3.bf16.msra.mxu0 %v937_v39  ;;  %551 = vmatprep.mubr.bf16.mxu0 %v34_v56 }
  0x24   :  { %512 = vmatmul.mubr.bf16.vlgmr.msra.gmra.mrb[0].mxu1 %v31_v41  ;;  %844 = vmatprep.subr.bf16.mxu0 %v938_v42 }
  0x25   :  { %877 = vmatprep.mubr.msk.bf16.mxu1 %vm990_vm0, %v989_v44  ;;  %876 = vmatpush3.bf16.msra.mxu1 %v952_v53 }
  0x26   :  { %881 = vmatprep.subr.bf16.mxu1 %v989_v44 }
  0x27   :  { %845 = vmatpush3.bf16.msra.mxu0 %v939_v43 }
  0x28   :  { %846 = vmatprep.subr.bf16.mxu0 %v940_v45 }
  0x2b   :  { %847 = vmatpush3.bf16.msra.mxu0 %v941_v46 }
  0x2c   :  { %848 = vmatprep.subr.bf16.mxu0 %v942_v47  ;;  %878 = vmatmul.mubr.msk.bf16.vlgmr.msra.gmra.mrb[4].mxu1 %vm435_vm1, %v35_v58 }
  0x2d   :  { %897 = vmatprep.mubr.msk.bf16.mxu1 %vm990_vm0, %v989_v44 }
  0x2f   :  { %849 = vmatpush3.bf16.msra.mxu0 %v943_v48 }
  0x30   :  { %850 = vmatprep.subr.bf16.mxu0 %v944_v49 }
  0x33   :  { %851 = vmatpush3.bf16.msra.mxu0 %v945_v50 }
  0x34   :  { %852 = vmatprep.subr.bf16.mxu0 %v946_v51 }
  0x37   :  { %853 = vmatpush3.bf16.msra.mxu0 %v947_v52 }
  0x38   :  { %10 = vsyncpa [#allocation3], 0  ;;  %854 = vmatprep.subr.bf16.mxu0 %v948_v55  ;;  %v950_v60 = vld [vmem:[%s1246_s1 + $0x178] sm:$0xff]   ;;  %v26_v62 = vld [vmem:[%s1245_s0 + $0x20] sm:$0xff]  ;;  %s991_s21 = smov [#allocation2]  }
  0x39   :  { %v951_v61 = vld [vmem:[%s1246_s1 + $0x138] sm:$0xff]   ;;  %v33_v63 = vpack.c.bf16 %v26_v62, %v26_v62  ;;  %v953_v0 = vld [vmem:[%s1248_s3] sm:$0xff]   ;;  %v954_v1 = vld [vmem:[%s1248_s3 + $0x8] sm:$0xff]   ;;  %s730_s22 = sshll.u32 %s991_s21, 4  ;;  %s731_s22 = int_to_ptr.vmem [resolvable:$true] %s730_s22 }
  0x3a   :  { %882 = vmatpush3.bf16.msra.mxu1 %v953_v0  ;;  %v955_v2 = vld [vmem:[%s1248_s3 + $0x10] sm:$0xff]   ;;  %v956_v3 = vld [vmem:[%s1248_s3 + $0x18] sm:$0xff]   ;;  %v957_v4 = vld [vmem:[%s1248_s3 + $0x20] sm:$0xff]   ;;  %p970_p1 = scmp.lt.s32.totalorder %s731_s22, %s731_s22 }
  0x3b   :  { %855 = vmatpush3.bf16.msra.mxu0 %v949_v59  ;;  %883 = vmatprep.subr.bf16.mxu1 %v989_v44  ;;  %v958_v5 = vld [vmem:[%s1248_s3 + $0x28] sm:$0xff]   ;;  %v959_v6 = vld [vmem:[%s1248_s3 + $0x30] sm:$0xff]   ;;  %v960_v7 = vld [vmem:[%s1248_s3 + $0x38] sm:$0xff]  }
  0x3c   :  { %856 = vmatprep.subr.bf16.mxu0 %v950_v60  ;;  %v738_v9 = vld [vmem:[%s1247_s2] ss:$0 sm:$0xff] }
  0x3d   :  { %v789_v34 = vld [vmem:[%s1249_s4] ss:$0 sm:$0xff]  ;;  %s965_s4 = scalar_lea.vmem %s731_s22, 128 }
  0x3e   :  { %884 = vmatpush3.bf16.msra.mxu1 %v954_v1  ;;  %p966_p0 = scmp.ne.s32.totalorder %s731_s22, %s965_s4  ;;  %p971_p2 = scmp.lt.s32.totalorder %s965_s4, %s965_s4 }
  0x3f   :  { %857 = vmatpush3.bf16.msra.mxu0 %v951_v61  ;;  %885 = vmatprep.subr.bf16.mxu1 %v989_v44 }
  0x40   :  { %p972_p3 = por %p971_p2, %p970_p1 }
  0x42   :  { %552 = vmatmul.mubr.bf16.vlgmr.msra.gmra.mrb[4].mxu0 %v33_v63  ;;  %886 = vmatpush3.bf16.msra.mxu1 %v955_v2  ;;  %p973_p4 = pnand %p972_p3, %p966_p0 }
  0x43   :  { %887 = vmatprep.subr.bf16.mxu1 %v989_v44 }
  0x46   :  { %888 = vmatpush3.bf16.msra.mxu1 %v956_v3 }
  0x47   :  { %889 = vmatprep.subr.bf16.mxu1 %v989_v44 }
  0x4a   :  { %890 = vmatpush3.bf16.msra.mxu1 %v957_v4 }
  0x4b   :  { %891 = vmatprep.subr.bf16.mxu1 %v989_v44 }
  0x4e   :  { %892 = vmatpush3.bf16.msra.mxu1 %v958_v5 }
  0x4f   :  { %893 = vmatprep.subr.bf16.mxu1 %v989_v44 }
  0x52   :  { %894 = vmatpush3.bf16.msra.mxu1 %v959_v6 }
  0x53   :  { %895 = vmatprep.subr.bf16.mxu1 %v989_v44 }
  0x56   :  { %896 = vmatpush3.bf16.msra.mxu1 %v960_v7 }
  0xf5   :  { %v814_v8 = vpop.f32.mrb[0].mxu0 }
  0xf6   :  { %v815_v10 = vpop.f32.mrb[1].mxu0 }
  0xf7   :  { %v816_v11 = vadd.f32 %v815_v10, %v814_v8  ;;  %v817_v12 = vpop.f32.mrb[2].mxu0  ;;  %v836_v13 = vpop.f32.mrb[0].mxu1 }
  0xf8   :  { %v818_v14 = vpop.f32.mrb[3].mxu0  ;;  %v837_v16 = vpop.f32.mrb[1].mxu1 }
  0xf9   :  { %v474_v15 = vadd.f32 %v816_v11, %v738_v9  ;;  %v838_v17 = vadd.f32 %v837_v16, %v836_v13  ;;  %v839_v18 = vpop.f32.mrb[2].mxu1 }
  0xfa   :  { %v840_v19 = vpop.f32.mrb[3].mxu1 }
  0xfb   :  { %v514_v20 = vadd.f32 %v838_v17, %v474_v15 }
  0xff   :  { %v593_v21 = vpop.f32.mrb[4].mxu1 }
 0x100   :  { %v879_v22 = vpop.f32.mrb[5].mxu1 }
 0x101   :  { %v596_v23 = vpop.f32.mrb[6].mxu1 }
 0x102   :  { %v880_v24 = vpop.f32.mrb[7].mxu1 }
 0x115   :  { %v858_v25 = vpop.f32.mrb[4].mxu0 }
 0x116   :  { %v859_v26 = vpop.f32.mrb[5].mxu0 }
 0x117   :  { %v860_v27 = vadd.f32 %v859_v26, %v858_v25  ;;  %v861_v28 = vpop.f32.mrb[6].mxu0 }
 0x118   :  { %v862_v29 = vpop.f32.mrb[7].mxu0 }
 0x119   :  { %v554_v30 = vadd.f32 %v860_v27, %v514_v20 }
 0x11b   :  { %v594_v31 = vadd.f32 %v593_v21, %v554_v30 }
 0x11d   :  { %v599_v32 = vmax.f32 %v594_v31, 0.0 }
 0x11f   :  { %v600_v33 = vpack.c.bf16 %v599_v32, %v599_v32 }
 0x121   :  { %898 = vmatmul.mubr.bf16.vlgmr.msra.gmra.mrb[8].mxu1 %v600_v33 }
 0x1f4   :  { %v706_v35 = vpop.f32.mrb[8].mxu1 }
 0x1f5   :  { %v707_v36 = vadd.f32 %v789_v34, %v706_v35  ;;  %v899_v37 = vpop.f32.mrb[9].mxu1 }
 0x1f6   :  { %v709_v38 = vpop.f32.mrb[10].mxu1 }
 0x1f7   :  { %712 = vmax.xlane.f32.xlu0 %v707_v36  ;;  %v900_v39 = vpop.f32.mrb[11].mxu1 }
 0x284   :  { %v713_v40 = vpop.xlane.xlu0 %712 }
 0x285   :  { %v714_v41 = vsub.f32 %v707_v36, %v713_v40 }
 0x287   :  { %v715_v42 = vmul.f32 1.442695, %v714_v41 }
 0x289   :  { %961 = vpow2.f32 %v715_v42 }
 0x293   :  { %v962_v43 = vpop.eup %961 }
 0x294   :  { %717 = vadd.xlane.f32.xlu0 %v962_v43 }
 0x321   :  { %v718_v44 = vpop.xlane.xlu0 %717 }
 0x322   :  { %963 = vlog2.f32 %v718_v44 }
 0x32c   :  { %v964_v45 = vpop.eup %963 }
 0x32d   :  { %v720_v46 = vmul.f32 0.6931472, %v964_v45 }
 0x32f   :  { %v721_v47 = vadd.f32 %v720_v46, %v713_v40 }
 0x331   :  { %v722_v48 = vsub.f32 %v707_v36, %v721_v47 }
 0x333   :  { %723 = vst [vmem:[#allocation2] sm:$0xff] %v722_v48 }
 0x334   :  { %976 = shalt.err (!%p973_p4)
}
 0x335   :  { %s977_s25 = scalar_lea.hbm %s1250_s5, 128 }
 0x336   :  { %p978_p5 = scmp.ne.s32.totalorder %s1250_s5, %s977_s25  ;;  %p981_p6 = scmp.lt.u32.totalorder %s977_s25, %s1250_s5 }
 0x338   :  { %p983_p7 = pnand %p981_p6, %p978_p5 }
 0x33a   :  { %986 = shalt.err (!%p983_p7)
}
 0x33b   :  { %733 = dma.vmem_to_hbm [thread:$0]  %s731_s22, 128, %s1250_s5, [#allocation3]  }
 0x33c   :  { %987 = dma.done.wait [#allocation3], 128  }
 0x33d   :  { %988 = vsyncadd [#allocation3], 4294967168 }
 0x33e   :  { %737 = vsyncpa [#allocation3], 1 }

</bundles_post_ra>
